<compile_context>
chip_gen: v7x
topology: tpu7x:2x2x1
jax: 0.10.0
libtpu: 0.0.40
codegen_flags: <defaults>
</compile_context>

<pallas_src>
import math

import jax
import jax.numpy as jnp
from jax.experimental import pallas as pl
from jax.experimental.pallas import tpu as pltpu

K_IN = 1000      # backbone feature dim (kept unpadded; block dim == array dim)
H = 100          # linear1 width
N_HOLE = 2
N_GROWTH = 3

HP = 128         # hidden padded to lane width
OP = 128         # fused {hole, growth} head output padded to lane width

TB_CAP = 2048    # max batch-tile rows


def _round_up(x, m):
    return (x + m - 1) // m * m


def _head_kernel(feat_ref, w1_ref, b1_ref, wh_ref, bh_ref, out_ref):
    # feat: [TB, 1000] f32 ; w1: [1000, 128] bf16 ; b1: [1, 128] f32
    # wh:   [128, 128] bf16 (fused hole|growth) ; bh: [1, 128] f32
    f = feat_ref[...].astype(jnp.bfloat16)          # VPU cast, hidden under DMA
    h = jnp.dot(f, w1_ref[...], preferred_element_type=jnp.float32)
    h = jnp.maximum(h + b1_ref[...], 0.0)
    out = jnp.dot(h.astype(jnp.bfloat16), wh_ref[...],
                  preferred_element_type=jnp.float32)
    out_ref[...] = (out + bh_ref[...]).astype(out_ref.dtype)   # bf16 writeback


def pack_params(params):
    """Pad (H->128), fuse the two heads, and bf16-cast weights.  Do once."""
    w1 = jnp.zeros((K_IN, HP), jnp.float32).at[:, :H].set(params["w1"])
    b1 = jnp.zeros((1, HP), jnp.float32).at[:, :H].set(params["b1"])
    wh = jnp.zeros((HP, OP), jnp.float32)
    wh = wh.at[:H, :N_HOLE].set(params["wh"])
    wh = wh.at[:H, N_HOLE:N_HOLE + N_GROWTH].set(params["wg"])
    bh = jnp.zeros((1, OP), jnp.float32)
    bh = bh.at[:, :N_HOLE].set(params["bh"])
    bh = bh.at[:, N_HOLE:N_HOLE + N_GROWTH].set(params["bg"])
    return {
        "w1": w1.astype(jnp.bfloat16),
        "b1": b1,                         # biases stay f32 (added post-MXU)
        "wh": wh.astype(jnp.bfloat16),
        "bh": bh,
    }


@jax.jit
def multilabel_tinynet_head(features, packed):
    """Fused linear1 -> ReLU -> {hole, growth} heads in one Pallas kernel."""
    B, K = features.shape
    assert K == K_IN, f"expected {K_IN}-d backbone features, got {K}"

    # Batch tile: ceil(B/2) rounded to a multiple of 16 (bf16 sublane packing),
    # capped at 2048.  ceil(B/2) guarantees >= 2 grid steps for B > 16 so both
    # v7x TensorCores get work; 2048x1000 f32 tiles double-buffered (~16 MiB)
    # plus resident weights and bf16 output stay under the 32 MiB VMEM limit.
    TB = max(16, min(TB_CAP, _round_up(-(-B // 2), 16)))
    B_pad = _round_up(B, TB)

    feat = features
    if B_pad != B:
        # Only the ragged-batch case pays for a padded copy (demo B=2 -> 16
        # rows).  Production batches should be multiples of 16 to skip this.
        feat = jnp.zeros((B_pad, K_IN), features.dtype).at[:B].set(features)

    grid = (B_pad // TB,)
    flops = 2 * B_pad * K_IN * HP + 2 * B_pad * HP * OP
    bytes_accessed = (B_pad * K_IN * 4      # features (f32, read once)
                      + K_IN * HP * 2       # w1 (bf16)
                      + HP * 4              # b1
                      + HP * OP * 2         # fused head weights (bf16)
                      + OP * 4              # fused head bias
                      + B_pad * OP * 2)     # lane-dense bf16 output

    out = pl.pallas_call(
        _head_kernel,
        grid=grid,
        in_specs=[
            pl.BlockSpec((TB, K_IN), lambda i: (i, 0)),   # features: batch-tiled
            pl.BlockSpec((K_IN, HP), lambda i: (0, 0)),   # w1: resident
            pl.BlockSpec((1, HP), lambda i: (0, 0)),      # b1: resident
            pl.BlockSpec((HP, OP), lambda i: (0, 0)),     # fused head W: resident
            pl.BlockSpec((1, OP), lambda i: (0, 0)),      # fused head b: resident
        ],
        out_specs=pl.BlockSpec((TB, OP), lambda i: (i, 0)),
        out_shape=jax.ShapeDtypeStruct((B_pad, OP), jnp.bfloat16),
        compiler_params=pltpu.CompilerParams(
            dimension_semantics=("parallel",),
            vmem_limit_bytes=32 * 1024 * 1024),
        cost_estimate=pl.CostEstimate(flops=flops, transcendentals=0,
                                      bytes_accessed=bytes_accessed),
    )(feat, packed["w1"], packed["b1"], packed["wh"], packed["bh"])

    # Matches the PyTorch multi-head branch's return structure (f32 outputs).
    return {
        "holes": out[:B, :N_HOLE].astype(jnp.float32),
        "growth": out[:B, N_HOLE:N_HOLE + N_GROWTH].astype(jnp.float32),
    }


def init_params(key):
    """Deterministic params matching MultilabelTinyNet.__init__ shapes.

    Weights ~ Normal(0, 0.01) (as in nn.init.normal_(w, 0, 0.01)).
    Biases ~ Uniform(-1/sqrt(fan_in), 1/sqrt(fan_in)) (PyTorch Linear default).
    Weights are stored as [in, out] (transposed vs PyTorch's [out, in]).
    """
    k1, k2, k3, k4, k5, k6 = jax.random.split(key, 6)
    bnd1 = 1.0 / math.sqrt(1000.0)
    bnd2 = 1.0 / math.sqrt(100.0)
    return {
        "w1": 0.01 * jax.random.normal(k1, (1000, 100), dtype=jnp.float32),
        "b1": jax.random.uniform(k2, (1, 100), jnp.float32, -bnd1, bnd1),
        "wh": 0.01 * jax.random.normal(k3, (100, 2), dtype=jnp.float32),
        "bh": jax.random.uniform(k4, (1, 2), jnp.float32, -bnd2, bnd2),
        "wg": 0.01 * jax.random.normal(k5, (100, 3), dtype=jnp.float32),
        "bg": jax.random.uniform(k6, (1, 3), jnp.float32, -bnd2, bnd2),
    }


if __name__ == "__main__":
    key = jax.random.PRNGKey(0)
    k_feat, k_params = jax.random.split(key)

    # Backbone (tinynet_a) output stand-in: [batch=2, 1000] features.
    features = jax.random.normal(k_feat, (2, 1000), dtype=jnp.float32)
    params = init_params(k_params)
    packed = pack_params(params)   # one-time fuse/pad/bf16 pack

    out = multilabel_tinynet_head(features, packed)
    jax.block_until_ready(out)

    # Reference in plain f32 JAX (original PyTorch semantics).  Kernel uses
    # bf16 matmul inputs + bf16 output with f32 accumulation, so tolerance is
    # loosened vs a pure-f32 check (outputs here are ~1e-2 magnitude).
    h_ref = jnp.maximum(features @ params["w1"] + params["b1"], 0.0)
    hole_ref = h_ref @ params["wh"] + params["bh"]
    growth_ref = h_ref @ params["wg"] + params["bg"]
    assert out["holes"].shape == (2, 2) and out["growth"].shape == (2, 3)
    assert jnp.allclose(out["holes"], hole_ref, atol=1e-2)
    assert jnp.allclose(out["growth"], growth_ref, atol=1e-2)

    print("KERNEL_OK")
</pallas_src>

<mosaic_0001>
module attributes {stable_mosaic.version = 11 : i64} {
  func.func @_head_kernel(%arg0: i32, %arg1: memref<16x1000xf32, #tpu.memory_space<vmem>>, %arg2: memref<1000x128xbf16, #tpu.memory_space<vmem>>, %arg3: memref<1x128xf32, #tpu.memory_space<vmem>>, %arg4: memref<128x128xbf16, #tpu.memory_space<vmem>>, %arg5: memref<1x128xf32, #tpu.memory_space<vmem>>, %arg6: memref<16x128xbf16, #tpu.memory_space<vmem>>) attributes {dimension_semantics = [#tpu.dimension_semantics<parallel>], iteration_bounds = array<i64: 1>, scalar_prefetch = 0 : i64, scratch_operands = 0 : i64, tpu.core_type = #tpu.core_type<tc>, window_params = [{transform_indices = @transform_0, window_bounds = array<i64: 16, 1000>}, {pipeline_mode = #tpu.pipeline_mode<synchronous>, transform_indices = @transform_1, window_bounds = array<i64: 1000, 128>}, {pipeline_mode = #tpu.pipeline_mode<synchronous>, transform_indices = @transform_2, window_bounds = array<i64: 1, 128>}, {pipeline_mode = #tpu.pipeline_mode<synchronous>, transform_indices = @transform_3, window_bounds = array<i64: 128, 128>}, {pipeline_mode = #tpu.pipeline_mode<synchronous>, transform_indices = @transform_4, window_bounds = array<i64: 1, 128>}, {transform_indices = @transform_5, window_bounds = array<i64: 16, 128>}]} {
    %c0 = arith.constant 0 : index
    %c0_0 = arith.constant 0 : index
    %0 = vector.load %arg1[%c0, %c0_0] : memref<16x1000xf32, #tpu.memory_space<vmem>>, vector<16x1000xf32>
    %1 = arith.truncf %0 : vector<16x1000xf32> to vector<16x1000xbf16>
    %c0_1 = arith.constant 0 : index
    %c0_2 = arith.constant 0 : index
    %2 = vector.load %arg2[%c0_1, %c0_2] : memref<1000x128xbf16, #tpu.memory_space<vmem>>, vector<1000x128xbf16>
    %cst = arith.constant dense<0.000000e+00> : vector<16x128xf32>
    %3 = tpu.matmul %1, %2, %cst {dimension_numbers = #tpu.dot_dimension_numbers<[1], [0], [0], [1], [0, 0, 1, 1], [], []>} : vector<16x1000xbf16>, vector<1000x128xbf16>, vector<16x128xf32> -> vector<16x128xf32>
    %c0_3 = arith.constant 0 : index
    %c0_4 = arith.constant 0 : index
    %4 = vector.load %arg3[%c0_3, %c0_4] : memref<1x128xf32, #tpu.memory_space<vmem>>, vector<1x128xf32>
    %5 = vector.broadcast %4 : vector<1x128xf32> to vector<16x128xf32>
    %6 = arith.addf %3, %5 : vector<16x128xf32>
    %cst_5 = arith.constant 0.000000e+00 : f32
    %7 = vector.broadcast %cst_5 : f32 to vector<16x128xf32>
    %8 = arith.maximumf %6, %7 : vector<16x128xf32>
    %9 = arith.truncf %8 : vector<16x128xf32> to vector<16x128xbf16>
    %c0_6 = arith.constant 0 : index
    %c0_7 = arith.constant 0 : index
    %10 = vector.load %arg4[%c0_6, %c0_7] : memref<128x128xbf16, #tpu.memory_space<vmem>>, vector<128x128xbf16>
    %cst_8 = arith.constant dense<0.000000e+00> : vector<16x128xf32>
    %11 = tpu.matmul %9, %10, %cst_8 {dimension_numbers = #tpu.dot_dimension_numbers<[1], [0], [0], [1], [0, 0, 1, 1], [], []>} : vector<16x128xbf16>, vector<128x128xbf16>, vector<16x128xf32> -> vector<16x128xf32>
    %c0_9 = arith.constant 0 : index
    %c0_10 = arith.constant 0 : index
    %12 = vector.load %arg5[%c0_9, %c0_10] : memref<1x128xf32, #tpu.memory_space<vmem>>, vector<1x128xf32>
    %13 = vector.broadcast %12 : vector<1x128xf32> to vector<16x128xf32>
    %14 = arith.addf %11, %13 : vector<16x128xf32>
    %15 = arith.truncf %14 : vector<16x128xf32> to vector<16x128xbf16>
    %c0_11 = arith.constant 0 : index
    %c0_12 = arith.constant 0 : index
    %16 = vector.load %arg6[%c0_11, %c0_12] : memref<16x128xbf16, #tpu.memory_space<vmem>>, vector<16x128xbf16>
    tpu.vector_store %arg6[%c0_11, %c0_12], %15 {strides = array<i32>} : memref<16x128xbf16, #tpu.memory_space<vmem>>, vector<16x128xbf16>,
    return
  }
  func.func @transform_0(%arg0: i32) -> (i32, i32) {
    %c0_i32 = arith.constant 0 : i32
    %c0_i32_0 = arith.constant 0 : i32
    return %arg0, %c0_i32 : i32, i32
  }
  func.func @transform_1(%arg0: i32) -> (i32, i32) {
    %c0_i32 = arith.constant 0 : i32
    %c0_i32_0 = arith.constant 0 : i32
    %c0_i32_1 = arith.constant 0 : i32
    return %c0_i32, %c0_i32_0 : i32, i32
  }
  func.func @transform_2(%arg0: i32) -> (i32, i32) {
    %c0_i32 = arith.constant 0 : i32
    %c0_i32_0 = arith.constant 0 : i32
    %c0_i32_1 = arith.constant 0 : i32
    return %c0_i32, %c0_i32_0 : i32, i32
  }
  func.func @transform_3(%arg0: i32) -> (i32, i32) {
    %c0_i32 = arith.constant 0 : i32
    %c0_i32_0 = arith.constant 0 : i32
    %c0_i32_1 = arith.constant 0 : i32
    return %c0_i32, %c0_i32_0 : i32, i32
  }
  func.func @transform_4(%arg0: i32) -> (i32, i32) {
    %c0_i32 = arith.constant 0 : i32
    %c0_i32_0 = arith.constant 0 : i32
    %c0_i32_1 = arith.constant 0 : i32
    return %c0_i32, %c0_i32_0 : i32, i32
  }
  func.func @transform_5(%arg0: i32) -> (i32, i32) {
    %c0_i32 = arith.constant 0 : i32
    %c0_i32_0 = arith.constant 0 : i32
    return %arg0, %c0_i32 : i32, i32
  }
}

</mosaic_0001>

<bundles_post_ra>
// kernel: multilabel_tinynet_head.1
= control target key start
LH: loop header
LB: loop body
LE: loop exit
PB: predicated region body
PF: predicated region fallthrough
CT: control target
= control target key end

     0   :  { %10 = vsyncpa [#allocation3], 0  ;;  %s1147_s18 = smov [#allocation2]   ;;  %s1291_s0 = inlined_call_operand.vmem [shape: f32[16,1000], index: 0, kind: input, shape index: {}]   ;;  %s1292_s1 = inlined_call_operand.hbm [shape: bf16[1000,128], index: 1, kind: input, shape index: {}]   ;;  %s1293_s2 = inlined_call_operand.vmem [shape: f32[1,128], index: 2, kind: input, shape index: {}]   ;;  %s1294_s3 = inlined_call_operand.vmem [shape: bf16[128,128], index: 3, kind: input, shape index: {}]   ;;  %s1295_s4 = inlined_call_operand.vmem [shape: f32[1,128], index: 4, kind: input, shape index: {}]   ;;  %s1296_s5 = inlined_call_operand.vmem [shape: bf16[16,128], index: 5, kind: output, shape index: {}]  }
   0x1   :  { %s18_s19 = sshll.u32 %s1147_s18, 4  ;;  %s1123_s22 = scalar_lea.hbm %s1292_s1, 8000  ;;  %s19_s19 = int_to_ptr.vmem [resolvable:$true] %s18_s19 }
   0x2   :  { %p1124_p0 = scmp.ne.s32.totalorder %s1292_s1, %s1123_s22  ;;  %p1127_p1 = scmp.lt.u32.totalorder %s1123_s22, %s1292_s1 }
   0x4   :  { %p1129_p2 = pnand %p1127_p1, %p1124_p0 }
   0x6   :  { %1132 = shalt.err (!%p1129_p2)
}
   0x7   :  { %s1133_s27 = scalar_lea.vmem %s19_s19, 8000  ;;  %p1138_p4 = scmp.lt.s32.totalorder %s19_s19, %s19_s19 }
   0x8   :  { %p1134_p3 = scmp.ne.s32.totalorder %s19_s19, %s1133_s27  ;;  %p1139_p5 = scmp.lt.s32.totalorder %s1133_s27, %s1133_s27 }
   0xa   :  { %p1140_p6 = por %p1139_p5, %p1138_p4 }
   0xc   :  { %p1141_p7 = pnand %p1140_p6, %p1134_p3 }
   0xe   :  { %1144 = shalt.err (!%p1141_p7)
}
   0xf   :  { %s1148_s28 = smov 64   ;;  %s1149_s29 = smov 4  }
  0x10   :  { %24 = dma.hbm_to_vmem [thread:$0]  %s1292_s1, 8000, %s19_s19, [#allocation3], %s1148_s28, %s1148_s28, %s1149_s29  }
  0x11   :  { %1145 = dma.done.wait [#allocation3], 8000  }
  0x12   :  { %1146 = vsyncadd [#allocation3], 4294959296  ;;  %v1052_v0 = vld [vmem:[#allocation2 + $0x40] sm:$0xff]   ;;  %v1056_v4 = vld [vmem:[#allocation2 + $0x48] sm:$0xff]   ;;  %v1150_v43 = vmov 0   ;;  %vm566_vm0 = vcmask 850944  }
  0x13   :  { %v1053_v1 = vld [vmem:[#allocation2 + $0xc0] sm:$0xff]   ;;  %951 = vmatprep.subr.bf16.mxu0 %v1052_v0  ;;  %v1057_v5 = vld [vmem:[#allocation2 + $0xc8] sm:$0xff]   ;;  %v1060_v8 = vld [vmem:[#allocation2 + $0x50] sm:$0xff]   ;;  %vm570_vm1 = vcmask 1043456   ;;  %vm1152_vm2 = vmmov 0  }
  0x14   :  { %v1054_v2 = vld [vmem:[#allocation2] sm:$0xff]   ;;  %973 = vmatprep.subr.bf16.mxu1 %v1053_v1  ;;  %v1058_v6 = vld [vmem:[#allocation2 + $0x8] sm:$0xff]   ;;  %v1061_v9 = vld [vmem:[#allocation2 + $0xd0] sm:$0xff]  }
  0x15   :  { %v1055_v3 = vld [vmem:[#allocation2 + $0x80] sm:$0xff]   ;;  %952 = vmatpush3.bf16.msra.mxu0 %v1054_v2  ;;  %v1059_v7 = vld [vmem:[#allocation2 + $0x88] sm:$0xff]   ;;  %v1062_v10 = vld [vmem:[#allocation2 + $0x10] sm:$0xff]  }
  0x16   :  { %974 = vmatpush3.bf16.msra.mxu1 %v1055_v3  ;;  %953 = vmatprep.subr.bf16.mxu0 %v1056_v4  ;;  %v1063_v11 = vld [vmem:[#allocation2 + $0x90] sm:$0xff]   ;;  %v1064_v12 = vld [vmem:[#allocation2 + $0x58] sm:$0xff]   ;;  %v1068_v16 = vld [vmem:[#allocation2 + $0x60] sm:$0xff]  }
  0x17   :  { %975 = vmatprep.subr.bf16.mxu1 %v1057_v5  ;;  %v1065_v13 = vld [vmem:[#allocation2 + $0xd8] sm:$0xff]   ;;  %v1069_v17 = vld [vmem:[#allocation2 + $0xe0] sm:$0xff]   ;;  %v1072_v20 = vld [vmem:[#allocation2 + $0x68] sm:$0xff]  }
  0x18   :  { %v1066_v14 = vld [vmem:[#allocation2 + $0x18] sm:$0xff]   ;;  %v1070_v18 = vld [vmem:[#allocation2 + $0x20] sm:$0xff]   ;;  %v1073_v21 = vld [vmem:[#allocation2 + $0xe8] sm:$0xff]  }
  0x19   :  { %954 = vmatpush3.bf16.msra.mxu0 %v1058_v6  ;;  %v1067_v15 = vld [vmem:[#allocation2 + $0x98] sm:$0xff]   ;;  %v1071_v19 = vld [vmem:[#allocation2 + $0xa0] sm:$0xff]   ;;  %v1074_v22 = vld [vmem:[#allocation2 + $0x28] sm:$0xff]  }
  0x1a   :  { %976 = vmatpush3.bf16.msra.mxu1 %v1059_v7  ;;  %955 = vmatprep.subr.bf16.mxu0 %v1060_v8  ;;  %v1075_v23 = vld [vmem:[#allocation2 + $0xa8] sm:$0xff]   ;;  %v1076_v24 = vld [vmem:[#allocation2 + $0x70] sm:$0xff]   ;;  %v1080_v28 = vld [vmem:[#allocation2 + $0x78] sm:$0xff]  }
  0x1b   :  { %977 = vmatprep.subr.bf16.mxu1 %v1061_v9  ;;  %v1077_v25 = vld [vmem:[#allocation2 + $0xf0] sm:$0xff]   ;;  %v1081_v29 = vld [vmem:[#allocation2 + $0xf8] sm:$0xff]   ;;  %v36_v32 = vld [vmem:[%s1291_s0 + $0x8] sm:$0xff] }
  0x1c   :  { %v1078_v26 = vld [vmem:[#allocation2 + $0x30] sm:$0xff]   ;;  %v1082_v30 = vld [vmem:[#allocation2 + $0x38] sm:$0xff]   ;;  %v44_v33 = vld [vmem:[%s1291_s0 + $0x48] sm:$0xff] }
  0x1d   :  { %956 = vmatpush3.bf16.msra.mxu0 %v1062_v10  ;;  %v1079_v27 = vld [vmem:[#allocation2 + $0xb0] sm:$0xff]   ;;  %v1083_v31 = vld [vmem:[#allocation2 + $0xb8] sm:$0xff]   ;;  %v52_v35 = vpack.c.bf16 %v44_v33, %v36_v32  ;;  %v35_v37 = vld [vmem:[%s1291_s0] sm:$0xff] }
  0x1e   :  { %978 = vmatpush3.bf16.msra.mxu1 %v1063_v11  ;;  %957 = vmatprep.subr.bf16.mxu0 %v1064_v12  ;;  %v38_v34 = vld [vmem:[%s1291_s0 + $0x18] sm:$0xff]  ;;  %v43_v38 = vld [vmem:[%s1291_s0 + $0x40] sm:$0xff]  ;;  %v37_v41 = vld [vmem:[%s1291_s0 + $0x10] sm:$0xff] }
  0x1f   :  { %979 = vmatprep.subr.bf16.mxu1 %v1065_v13  ;;  %v46_v36 = vld [vmem:[%s1291_s0 + $0x58] sm:$0xff]  ;;  %v51_v40 = vpack.c.bf16 %v43_v38, %v35_v37  ;;  %v45_v42 = vld [vmem:[%s1291_s0 + $0x50] sm:$0xff]  ;;  %606 = vmatprep.mubr.bf16.mxu0 %v52_v35  ;;  %v1084_v45 = vld [vmem:[#allocation2 + $0x140] sm:$0xff]  }
  0x20   :  { %v54_v39 = vpack.c.bf16 %v46_v36, %v38_v34  ;;  %v53_v44 = vpack.c.bf16 %v45_v42, %v37_v41  ;;  %v1085_v46 = vld [vmem:[#allocation2 + $0x100] sm:$0xff]   ;;  %v1087_v48 = vld [vmem:[#allocation2 + $0x148] sm:$0xff]   ;;  %v1090_v51 = vld [vmem:[#allocation2 + $0x150] sm:$0xff]  }
  0x21   :  { %958 = vmatpush3.bf16.msra.mxu0 %v1066_v14  ;;  %v1086_v47 = vld [vmem:[#allocation2 + $0x180] sm:$0xff]   ;;  %v1088_v49 = vld [vmem:[#allocation2 + $0x108] sm:$0xff]   ;;  %v1091_v52 = vld [vmem:[#allocation2 + $0x110] sm:$0xff]  }
  0x22   :  { %980 = vmatpush3.bf16.msra.mxu1 %v1067_v15  ;;  %959 = vmatprep.subr.bf16.mxu0 %v1068_v16  ;;  %v1089_v50 = vld [vmem:[#allocation2 + $0x188] sm:$0xff]   ;;  %v1092_v53 = vld [vmem:[#allocation2 + $0x190] sm:$0xff]   ;;  %v1093_v54 = vld [vmem:[#allocation2 + $0x158] sm:$0xff]  }
  0x23   :  { %981 = vmatprep.subr.bf16.mxu1 %v1069_v17  ;;  %647 = vmatprep.mubr.bf16.mxu1 %v54_v39  ;;  %v1094_v55 = vld [vmem:[#allocation2 + $0x118] sm:$0xff]   ;;  %v1096_v57 = vld [vmem:[#allocation2 + $0x160] sm:$0xff]   ;;  %v1099_v60 = vld [vmem:[#allocation2 + $0x168] sm:$0xff]  }
  0x24   :  { %v1095_v56 = vld [vmem:[#allocation2 + $0x198] sm:$0xff]   ;;  %v1097_v58 = vld [vmem:[#allocation2 + $0x120] sm:$0xff]   ;;  %v1100_v61 = vld [vmem:[#allocation2 + $0x128] sm:$0xff]  }
  0x25   :  { %960 = vmatpush3.bf16.msra.mxu0 %v1070_v18  ;;  %v1098_v59 = vld [vmem:[#allocation2 + $0x1a0] sm:$0xff]   ;;  %v1101_v62 = vld [vmem:[#allocation2 + $0x1a8] sm:$0xff]   ;;  %v1102_v63 = vld [vmem:[#allocation2 + $0x170] sm:$0xff]  }
  0x26   :  { %982 = vmatpush3.bf16.msra.mxu1 %v1071_v19  ;;  %961 = vmatprep.subr.bf16.mxu0 %v1072_v20  ;;  %v1103_v0 = vld [vmem:[#allocation2 + $0x130] sm:$0xff]   ;;  %v40_v1 = vld [vmem:[%s1291_s0 + $0x28] sm:$0xff]  ;;  %v1105_v3 = vld [vmem:[#allocation2 + $0x178] sm:$0xff]  }
  0x27   :  { %983 = vmatprep.subr.bf16.mxu1 %v1073_v21  ;;  %v1104_v2 = vld [vmem:[#allocation2 + $0x1b0] sm:$0xff]   ;;  %v48_v4 = vld [vmem:[%s1291_s0 + $0x68] sm:$0xff]  ;;  %v1106_v5 = vld [vmem:[#allocation2 + $0x138] sm:$0xff]  }
  0x28   :  { %v56_v6 = vpack.c.bf16 %v48_v4, %v40_v1  ;;  %v39_v7 = vld [vmem:[%s1291_s0 + $0x20] sm:$0xff]  ;;  %v1107_v9 = vld [vmem:[#allocation2 + $0x1b8] sm:$0xff]   ;;  %v1109_v15 = vld [vmem:[#allocation2 + $0x1c8] sm:$0xff]  }
  0x29   :  { %962 = vmatpush3.bf16.msra.mxu0 %v1074_v22  ;;  %v47_v8 = vld [vmem:[%s1291_s0 + $0x60] sm:$0xff]  ;;  %v42_v11 = vld [vmem:[%s1291_s0 + $0x38] sm:$0xff]  ;;  %v1110_v16 = vld [vmem:[#allocation2 + $0x1d0] sm:$0xff]  }
  0x2a   :  { %984 = vmatpush3.bf16.msra.mxu1 %v1075_v23  ;;  %963 = vmatprep.subr.bf16.mxu0 %v1076_v24  ;;  %v55_v10 = vpack.c.bf16 %v47_v8, %v39_v7  ;;  %v1108_v12 = vld [vmem:[#allocation2 + $0x1c0] sm:$0xff]   ;;  %v50_v13 = vld [vmem:[%s1291_s0 + $0x78] sm:$0xff]  ;;  %v1113_v19 = vld [vmem:[#allocation2 + $0x1e8] sm:$0xff]  }
  0x2b   :  { %985 = vmatprep.subr.bf16.mxu1 %v1077_v25  ;;  %v58_v14 = vpack.c.bf16 %v50_v13, %v42_v11  ;;  %v1111_v17 = vld [vmem:[#allocation2 + $0x1d8] sm:$0xff]   ;;  %v1112_v18 = vld [vmem:[#allocation2 + $0x1e0] sm:$0xff]   ;;  %v1114_v20 = vld [vmem:[#allocation2 + $0x1f0] ss:$0 sps:$4 sm:$0xff]  }
  0x2c   :  { %v41_v21 = vld [vmem:[%s1291_s0 + $0x30] sm:$0xff]  ;;  %v572_v23 = vsel %vm570_vm1, %v1114_v20, 0  ;;  %v1115_v25 = vld [vmem:[%s1294_s3] sm:$0xff]   ;;  %v1122_v33 = vld [vmem:[%s1294_s3 + $0x38] sm:$0xff]  }
  0x2d   :  { %964 = vmatpush3.bf16.msra.mxu0 %v1078_v26  ;;  %v49_v22 = vld [vmem:[%s1291_s0 + $0x70] sm:$0xff]  ;;  %v1151_v26 = vmov 0.0   ;;  %v868_v36 = vld [vmem:[%s1293_s2] ss:$0 sm:$0xff] }
  0x2e   :  { %986 = vmatpush3.bf16.msra.mxu1 %v1079_v27  ;;  %965 = vmatprep.subr.bf16.mxu0 %v1080_v28  ;;  %v57_v24 = vpack.c.bf16 %v49_v22, %v41_v21  ;;  %v1116_v27 = vld [vmem:[%s1294_s3 + $0x8] sm:$0xff]   ;;  %v1117_v28 = vld [vmem:[%s1294_s3 + $0x10] sm:$0xff]   ;;  %v933_v4 = vld [vmem:[%s1295_s4] ss:$0 sm:$0xff] }
  0x2f   :  { %987 = vmatprep.subr.bf16.mxu1 %v1081_v29  ;;  %v1118_v29 = vld [vmem:[%s1294_s3 + $0x18] sm:$0xff]   ;;  %v1121_v32 = vld [vmem:[%s1294_s3 + $0x30] sm:$0xff]  }
  0x31   :  { %966 = vmatpush3.bf16.msra.mxu0 %v1082_v30  ;;  %v1119_v30 = vld [vmem:[%s1294_s3 + $0x20] sm:$0xff]  }
  0x32   :  { %988 = vmatpush3.bf16.msra.mxu1 %v1083_v31  ;;  %995 = vmatprep.subr.bf16.mxu0 %v1084_v45  ;;  %v1120_v31 = vld [vmem:[%s1294_s3 + $0x28] sm:$0xff]  }
  0x33   :  { %697 = vmatprep.subr.bf16.mxu1 %v1150_v43 }
  0x34   :  { %607 = vmatmul.mubr.bf16.vlgmr.msra.gmra.mrb[0].mxu0 %v51_v40 }
  0x35   :  { %648 = vmatmul.mubr.bf16.vlgmr.msra.gmra.mrb[0].mxu1 %v53_v44  ;;  %996 = vmatpush3.bf16.msra.mxu0 %v1085_v46 }
  0x36   :  { %698 = vmatpush1.bf16.msra.mxu1 %v1086_v47  ;;  %997 = vmatprep.subr.bf16.mxu0 %v1087_v48 }
  0x37   :  { %699 = vmatprep.subr.bf16.mxu1 %v1150_v43  ;;  %688 = vmatprep.mubr.bf16.mxu0 %v56_v6 }
  0x38   :  { %932 = vmatprep.mubr.msk.bf16.mxu1 %vm566_vm0, %v58_v14 }
  0x39   :  { %998 = vmatpush3.bf16.msra.mxu0 %v1088_v49 }
  0x3a   :  { %700 = vmatpush1.bf16.msra.mxu1 %v1089_v50  ;;  %999 = vmatprep.subr.bf16.mxu0 %v1090_v51 }
  0x3b   :  { %701 = vmatprep.subr.bf16.mxu1 %v1150_v43 }
  0x3d   :  { %1000 = vmatpush3.bf16.msra.mxu0 %v1091_v52 }
  0x3e   :  { %702 = vmatpush1.bf16.msra.mxu1 %v1092_v53  ;;  %1001 = vmatprep.subr.bf16.mxu0 %v1093_v54 }
  0x3f   :  { %703 = vmatprep.subr.bf16.mxu1 %v1150_v43 }
  0x41   :  { %1002 = vmatpush3.bf16.msra.mxu0 %v1094_v55 }
  0x42   :  { %704 = vmatpush1.bf16.msra.mxu1 %v1095_v56  ;;  %1003 = vmatprep.subr.bf16.mxu0 %v1096_v57 }
  0x43   :  { %705 = vmatprep.subr.bf16.mxu1 %v1150_v43 }
  0x45   :  { %1004 = vmatpush3.bf16.msra.mxu0 %v1097_v58 }
  0x46   :  { %706 = vmatpush1.bf16.msra.mxu1 %v1098_v59  ;;  %1005 = vmatprep.subr.bf16.mxu0 %v1099_v60 }
  0x47   :  { %707 = vmatprep.subr.bf16.mxu1 %v1150_v43 }
  0x49   :  { %1006 = vmatpush3.bf16.msra.mxu0 %v1100_v61 }
  0x4a   :  { %708 = vmatpush1.bf16.msra.mxu1 %v1101_v62  ;;  %1007 = vmatprep.subr.bf16.mxu0 %v1102_v63 }
  0x4b   :  { %709 = vmatprep.subr.bf16.mxu1 %v1150_v43 }
  0x4d   :  { %1008 = vmatpush3.bf16.msra.mxu0 %v1103_v0 }
  0x4e   :  { %710 = vmatpush1.bf16.msra.mxu1 %v1104_v2  ;;  %1009 = vmatprep.subr.bf16.mxu0 %v1105_v3 }
  0x4f   :  { %711 = vmatprep.subr.bf16.mxu1 %v1150_v43 }
  0x51   :  { %1010 = vmatpush3.bf16.msra.mxu0 %v1106_v5 }
  0x52   :  { %712 = vmatpush1.bf16.msra.mxu1 %v1107_v9  ;;  %1026 = vmatprep.subr.bf16.mxu0 %v1151_v26 }
  0x53   :  { %713 = vmatprep.subr.bf16.mxu1 %v1150_v43 }
  0x54   :  { %689 = vmatmul.mubr.bf16.vlgmr.msra.gmra.mrb[4].mxu0 %v55_v10 }
  0x55   :  { %1027 = vmatpush3.bf16.msra.mxu0 %v1115_v25  ;;  %1042 = vmatprep.mubr.msk.bf16.mxu0 %vm1152_vm2, %v1151_v26 }
  0x56   :  { %714 = vmatpush1.bf16.msra.mxu1 %v1108_v12  ;;  %1028 = vmatprep.subr.bf16.mxu0 %v1151_v26 }
  0x57   :  { %715 = vmatprep.subr.bf16.mxu1 %v1150_v43 }
  0x59   :  { %1029 = vmatpush3.bf16.msra.mxu0 %v1116_v27 }
  0x5a   :  { %716 = vmatpush1.bf16.msra.mxu1 %v1109_v15  ;;  %1030 = vmatprep.subr.bf16.mxu0 %v1151_v26 }
  0x5b   :  { %717 = vmatprep.subr.bf16.mxu1 %v1150_v43 }
  0x5d   :  { %1031 = vmatpush3.bf16.msra.mxu0 %v1117_v28 }
  0x5e   :  { %718 = vmatpush1.bf16.msra.mxu1 %v1110_v16  ;;  %1032 = vmatprep.subr.bf16.mxu0 %v1151_v26 }
  0x5f   :  { %719 = vmatprep.subr.bf16.mxu1 %v1150_v43 }
  0x61   :  { %1033 = vmatpush3.bf16.msra.mxu0 %v1118_v29 }
  0x62   :  { %720 = vmatpush1.bf16.msra.mxu1 %v1111_v17  ;;  %1034 = vmatprep.subr.bf16.mxu0 %v1151_v26 }
  0x63   :  { %721 = vmatprep.subr.bf16.mxu1 %v1150_v43 }
  0x65   :  { %1035 = vmatpush3.bf16.msra.mxu0 %v1119_v30 }
  0x66   :  { %722 = vmatpush1.bf16.msra.mxu1 %v1112_v18  ;;  %1036 = vmatprep.subr.bf16.mxu0 %v1151_v26 }
  0x67   :  { %723 = vmatprep.subr.bf16.mxu1 %v1150_v43 }
  0x69   :  { %1037 = vmatpush3.bf16.msra.mxu0 %v1120_v31 }
  0x6a   :  { %724 = vmatpush1.bf16.msra.mxu1 %v1113_v19  ;;  %1038 = vmatprep.subr.bf16.mxu0 %v1151_v26 }
  0x6b   :  { %725 = vmatprep.subr.bf16.mxu1 %v1150_v43 }
  0x6d   :  { %1039 = vmatpush3.bf16.msra.mxu0 %v1121_v32 }
  0x6e   :  { %726 = vmatpush1.bf16.msra.mxu1 %v572_v23  ;;  %1040 = vmatprep.subr.bf16.mxu0 %v1151_v26 }
  0x71   :  { %730 = vmatmul.mubr.bf16.vlgmr.msra.gmra.mrb[4].mxu1 %v57_v24  ;;  %1041 = vmatpush3.bf16.msra.mxu0 %v1122_v33 }
 0x107   :  { %v967_v34 = vpop.f32.mrb[0].mxu0 }
 0x108   :  { %v989_v35 = vpop.f32.mrb[0].mxu1  ;;  %v968_v37 = vpop.f32.mrb[1].mxu0 }
 0x109   :  { %v969_v38 = vadd.f32 %v968_v37, %v967_v34  ;;  %v990_v39 = vpop.f32.mrb[1].mxu1  ;;  %v970_v40 = vpop.f32.mrb[2].mxu0 }
 0x10a   :  { %v991_v41 = vadd.f32 %v990_v39, %v989_v35  ;;  %v992_v42 = vpop.f32.mrb[2].mxu1  ;;  %v971_v43 = vpop.f32.mrb[3].mxu0 }
 0x10b   :  { %v609_v44 = vadd.f32 %v969_v38, %v868_v36  ;;  %v972_v45 = vadd.f32 %v971_v43, %v970_v40  ;;  %v993_v46 = vpop.f32.mrb[3].mxu1 }
 0x10c   :  { %v994_v47 = vadd.f32 %v993_v46, %v992_v42 }
 0x10d   :  { %v650_v48 = vadd.f32 %v991_v41, %v609_v44  ;;  %v612_v49 = vadd.f32 %v972_v45, %v868_v36 }
 0x10f   :  { %v653_v50 = vadd.f32 %v994_v47, %v612_v49 }
 0x127   :  { %v1011_v51 = vpop.f32.mrb[4].mxu0 }
 0x128   :  { %v1012_v52 = vpop.f32.mrb[5].mxu0 }
 0x129   :  { %v1013_v53 = vadd.f32 %v1012_v52, %v1011_v51  ;;  %v1014_v54 = vpop.f32.mrb[6].mxu0 }
 0x12a   :  { %v1015_v55 = vpop.f32.mrb[7].mxu0 }
 0x12b   :  { %v1016_v56 = vadd.f32 %v1015_v55, %v1014_v54  ;;  %v691_v57 = vadd.f32 %v1013_v53, %v650_v48 }
 0x12d   :  { %v694_v58 = vadd.f32 %v1016_v56, %v653_v50 }
 0x144   :  { %v731_v59 = vpop.f32.mrb[4].mxu1 }
 0x145   :  { %v732_v60 = vadd.f32 %v731_v59, %v691_v57  ;;  %v733_v61 = vpop.f32.mrb[5].mxu1 }
 0x146   :  { %v734_v62 = vpop.f32.mrb[6].mxu1 }
 0x147   :  { %v735_v63 = vadd.f32 %v734_v62, %v694_v58  ;;  %v736_v0 = vpop.f32.mrb[7].mxu1  ;;  %v738_v1 = vmax.f32 %v732_v60, 0.0 }
 0x149   :  { %v739_v2 = vmax.f32 %v735_v63, 0.0 }
 0x14b   :  { %v740_v3 = vpack.c.bf16 %v739_v2, %v738_v1 }
 0x14d   :  { %1043 = vmatmul.mubr.bf16.vlgmr.msra.gmra.mrb[8].mxu0 %v740_v3 }
 0x220   :  { %v846_v5 = vpop.f32.mrb[8].mxu0 }
 0x221   :  { %v1044_v6 = vpop.f32.mrb[9].mxu0  ;;  %v847_v8 = vadd.f32 %v933_v4, %v846_v5 }
 0x222   :  { %v849_v7 = vpop.f32.mrb[10].mxu0 }
 0x223   :  { %v850_v9 = vadd.f32 %v933_v4, %v849_v7  ;;  %v1045_v10 = vpop.f32.mrb[11].mxu0 }
 0x225   :  { %v949_v11 = vpack.c.bf16 %v850_v9, %v847_v8 }
 0x227   :  { %950 = vst [vmem:[%s1296_s5] sm:$0xff] %v949_v11  }
 0x228   :  { %867 = vsyncpa [#allocation3], 1 }

</bundles_post_ra>
